<compile_context>
chip_gen: v7x
topology: tpu7x:2x2x1
jax: 0.10.0
libtpu: 0.0.40
codegen_flags: <defaults>
</compile_context>

<pallas_src>
import jax
import jax.numpy as jnp
from jax.experimental import pallas as pl
from jax.experimental.pallas import tpu as pltpu


BANDS = 12             # bands per month (x.view(B, 6, 12, H, W))
MONTHS = 6
LANE_TILE_CAP = 65536  # pixels per grid step (lane dim); ~10 MiB/step in VMEM


# ----------------------------------------------------------------------------
# Fused kernel: encoder projection + tanh + 1x1-conv classifier
# ----------------------------------------------------------------------------
def _fused_kernel(x_ref, ew_ref, cw_ref, b_ref, o_ref):
    # x_ref:  (12, tl)  last-month bands for tl pixels (native dtype)
    # ew_ref: (D, 12)   encoder projection, transposed, f32
    # cw_ref: (K8, D)   classifier weight, transposed, zero-padded to 8 rows
    # b_ref:  (K, 1)    classifier bias (unpadded)
    # o_ref:  (K, tl)   logits slab (channels-first -> NCHW for free)
    x = x_ref[...].astype(jnp.float32)                                  # VPU upcast
    h = jnp.tanh(jnp.dot(ew_ref[...], x,
                         preferred_element_type=jnp.float32))           # (D, tl)
    acc = jnp.dot(cw_ref[...], h, preferred_element_type=jnp.float32)   # (K8, tl)
    k = o_ref.shape[0]
    o_ref[...] = (acc[:k] + b_ref[...]).astype(o_ref.dtype)             # K-wide store


def _lane_tile(hw, batch):
    """Pick the pixel tile along the lane axis (multiple of 128 when tiled)."""
    cap = LANE_TILE_CAP
    # Keep >= 2 grid steps when batch == 1 so v7x's 2 TensorCores both work.
    if batch == 1 and hw > 256:
        cap = min(cap, max(128, ((hw // 2) // 128) * 128))
    if hw <= cap:
        return hw                     # full-extent lane block (always legal)
    t = cap
    while t > 128 and hw % t != 0:    # prefer an evenly dividing 128-multiple
        t -= 128
    return t                          # otherwise ragged last block (masked)


# ----------------------------------------------------------------------------
# Module forward
# ----------------------------------------------------------------------------
def _pixelwise_patch_classifier_forward(x, enc_proj, cls_w, cls_b):
    """x: (B, 72, H, W)  ->  logits (B, num_classes, H, W) f32 (NCHW)."""
    B, C, H, W = x.shape
    assert C == MONTHS * BANDS, "forward implies x.view(B, 6, 12, H, W)"
    D, K = cls_w.shape
    assert enc_proj.shape == (BANDS, D)

    HW = H * W
    tl = _lane_tile(HW, B)
    n_tiles = pl.cdiv(HW, tl)
    grid = (n_tiles, B)               # larger axis first for megacore sharding

    # Tiny parameter layouts (fused under jit; effectively free).
    K8 = ((K + 7) // 8) * 8
    ew_t = jnp.asarray(enc_proj, jnp.float32).T                               # (D, 12)
    cw_t = jnp.zeros((K8, D), jnp.float32).at[:K].set(
        jnp.asarray(cls_w, jnp.float32).T)                                    # (K8, D)
    b_t = jnp.asarray(cls_b, jnp.float32).reshape(K, 1)                       # (K, 1)

    # Free reshape: (B, 72, H, W) -> (B, 6, 12, H*W); native dtype (no astype).
    # The BlockSpec below DMAs only timestep T-1's 12 bands (1/6 of x).
    x4 = x.reshape(B, MONTHS, BANDS, HW)
    t_last = MONTHS - 1

    itemsize = jnp.dtype(x.dtype).itemsize
    cost = pl.CostEstimate(
        flops=2 * B * HW * D * (BANDS + K),
        transcendentals=B * HW * D,
        bytes_accessed=B * BANDS * HW * itemsize            # last-month input
        + B * K * HW * 4                                    # logits out
        + (D * BANDS + K8 * D + K) * 4,                     # params
    )

    out = pl.pallas_call(
        _fused_kernel,
        out_shape=jax.ShapeDtypeStruct((B, K, HW), jnp.float32),
        grid_spec=pltpu.PrefetchScalarGridSpec(
            num_scalar_prefetch=0,
            grid=grid,
            in_specs=[
                # last-month bands for this pixel tile -> kernel sees (12, tl)
                pl.BlockSpec((None, None, BANDS, tl),
                             lambda j, b: (b, t_last, 0, j)),
                pl.BlockSpec((D, BANDS), lambda j, b: (0, 0)),   # enc_proj^T
                pl.BlockSpec((K8, D), lambda j, b: (0, 0)),      # cls_w^T (padded)
                pl.BlockSpec((K, 1), lambda j, b: (0, 0)),       # bias
            ],
            # Channels-first, K-wide output slab: lane-dense stores, NCHW free.
            out_specs=pl.BlockSpec((None, K, tl), lambda j, b: (b, 0, j)),
        ),
        compiler_params=pltpu.CompilerParams(
            # both grid axes independent -> shardable across v7x's 2 TensorCores
            dimension_semantics=("parallel", "parallel")),
        cost_estimate=cost,
    )(x4, ew_t, cw_t, b_t)

    return out.reshape(B, K, H, W)    # no padded-class slice, no transpose


pixelwise_patch_classifier_forward = jax.jit(_pixelwise_patch_classifier_forward)


if __name__ == "__main__":
    B, H, W = 2, 16, 16
    C = MONTHS * BANDS          # 72 = 6 months x 12 bands
    D = 32                      # encoder.embedding_size (synthetic)
    NUM_CLASSES = 5

    key = jax.random.PRNGKey(0)
    k_x, k_enc, k_w, k_b = jax.random.split(key, 4)

    x = jax.random.normal(k_x, (B, C, H, W), dtype=jnp.float32)

    # Synthetic stand-in encoder projection (deterministic).
    enc_proj = jax.random.normal(k_enc, (BANDS, D), dtype=jnp.float32) * 0.1

    # nn.Conv2d(D, NUM_CLASSES, kernel_size=1) parameters, PyTorch-style init.
    bound = 1.0 / jnp.sqrt(jnp.float32(D))
    cls_w = jax.random.uniform(k_w, (D, NUM_CLASSES), jnp.float32, -bound, bound)
    cls_b = jax.random.uniform(k_b, (NUM_CLASSES,), jnp.float32, -bound, bound)

    out = pixelwise_patch_classifier_forward(x, enc_proj, cls_w, cls_b)
    out = jax.block_until_ready(out)
    assert out.shape == (B, NUM_CLASSES, H, W), out.shape

    # Reference: the un-fused, un-sliced stand-in path (mirrors the PyTorch
    # module's order of operations) in plain JAX.
    xt = x.reshape(B, MONTHS, BANDS, H, W).transpose(0, 1, 3, 4, 2)
    feats_last = jnp.tanh(jnp.einsum("bthwc,cd->bthwd", xt, enc_proj))[:, -1]
    ref = jnp.einsum("bhwd,dk->bhwk", feats_last, cls_w) + cls_b
    ref = jnp.transpose(ref, (0, 3, 1, 2))
    max_err = float(jnp.max(jnp.abs(out - ref)))
    # Slightly loose tolerance: in-kernel tanh/MXU vs XLA einsum/tanh paths.
    assert jnp.allclose(out, ref, atol=1e-3, rtol=1e-3), max_err

    print("KERNEL_OK")
</pallas_src>

<mosaic_0001>
module attributes {stable_mosaic.version = 11 : i64} {
  func.func @_fused_kernel(%arg0: i32, %arg1: i32, %arg2: memref<1x1x12x256xf32, #tpu.memory_space<vmem>>, %arg3: memref<32x12xf32, #tpu.memory_space<vmem>>, %arg4: memref<8x32xf32, #tpu.memory_space<vmem>>, %arg5: memref<5x1xf32, #tpu.memory_space<vmem>>, %arg6: memref<1x5x256xf32, #tpu.memory_space<vmem>>) attributes {dimension_semantics = [#tpu.dimension_semantics<parallel>, #tpu.dimension_semantics<parallel>], iteration_bounds = array<i64: 1, 2>, scalar_prefetch = 0 : i64, scratch_operands = 0 : i64, tpu.core_type = #tpu.core_type<tc>, window_params = [{transform_indices = @transform_0, window_bounds = array<i64: 1, 1, 12, 256>}, {pipeline_mode = #tpu.pipeline_mode<synchronous>, transform_indices = @transform_1, window_bounds = array<i64: 32, 12>}, {pipeline_mode = #tpu.pipeline_mode<synchronous>, transform_indices = @transform_2, window_bounds = array<i64: 8, 32>}, {pipeline_mode = #tpu.pipeline_mode<synchronous>, transform_indices = @transform_3, window_bounds = array<i64: 5, 1>}, {transform_indices = @transform_4, window_bounds = array<i64: 1, 5, 256>}]} {
    %c0 = arith.constant 0 : index
    %c0_0 = arith.constant 0 : index
    %c0_1 = arith.constant 0 : index
    %c0_2 = arith.constant 0 : index
    %0 = vector.load %arg2[%c0, %c0_0, %c0_1, %c0_2] : memref<1x1x12x256xf32, #tpu.memory_space<vmem>>, vector<1x1x12x256xf32>
    %1 = vector.shape_cast %0 : vector<1x1x12x256xf32> to vector<12x256xf32>
    %c0_3 = arith.constant 0 : index
    %c0_4 = arith.constant 0 : index
    %2 = vector.load %arg3[%c0_3, %c0_4] : memref<32x12xf32, #tpu.memory_space<vmem>>, vector<32x12xf32>
    %cst = arith.constant dense<0.000000e+00> : vector<32x256xf32>
    %3 = tpu.matmul %2, %1, %cst {dimension_numbers = #tpu.dot_dimension_numbers<[1], [0], [0], [1], [0, 0, 1, 1], [], []>} : vector<32x12xf32>, vector<12x256xf32>, vector<32x256xf32> -> vector<32x256xf32>
    %4 = math.tanh %3 : vector<32x256xf32>
    %c0_5 = arith.constant 0 : index
    %c0_6 = arith.constant 0 : index
    %5 = vector.load %arg4[%c0_5, %c0_6] : memref<8x32xf32, #tpu.memory_space<vmem>>, vector<8x32xf32>
    %cst_7 = arith.constant dense<0.000000e+00> : vector<8x256xf32>
    %6 = tpu.matmul %5, %4, %cst_7 {dimension_numbers = #tpu.dot_dimension_numbers<[1], [0], [0], [1], [0, 0, 1, 1], [], []>} : vector<8x32xf32>, vector<32x256xf32>, vector<8x256xf32> -> vector<8x256xf32>
    %7 = vector.extract_strided_slice %6 {offsets = [0, 0], sizes = [5, 256], strides = [1, 1]} : vector<8x256xf32> to vector<5x256xf32>
    %c0_8 = arith.constant 0 : index
    %c0_9 = arith.constant 0 : index
    %8 = vector.load %arg5[%c0_8, %c0_9] : memref<5x1xf32, #tpu.memory_space<vmem>>, vector<5x1xf32>
    %9 = vector.broadcast %8 : vector<5x1xf32> to vector<5x256xf32>
    %10 = arith.addf %7, %9 : vector<5x256xf32>
    %c0_10 = arith.constant 0 : index
    %c0_11 = arith.constant 0 : index
    %c0_12 = arith.constant 0 : index
    %11 = vector.load %arg6[%c0_10, %c0_11, %c0_12] : memref<1x5x256xf32, #tpu.memory_space<vmem>>, vector<1x5x256xf32>
    %12 = vector.shape_cast %11 : vector<1x5x256xf32> to vector<5x256xf32>
    %13 = vector.shape_cast %10 : vector<5x256xf32> to vector<1x5x256xf32>
    tpu.vector_store %arg6[%c0_10, %c0_11, %c0_12], %13 {strides = array<i32>} : memref<1x5x256xf32, #tpu.memory_space<vmem>>, vector<1x5x256xf32>,
    return
  }
  func.func @transform_0(%arg0: i32, %arg1: i32) -> (i32, i32, i32, i32) {
    %c5_i32 = arith.constant 5 : i32
    %c0_i32 = arith.constant 0 : i32
    %c0_i32_0 = arith.constant 0 : i32
    return %arg1, %c5_i32, %c0_i32, %arg0 : i32, i32, i32, i32
  }
  func.func @transform_1(%arg0: i32, %arg1: i32) -> (i32, i32) {
    %c0_i32 = arith.constant 0 : i32
    %c0_i32_0 = arith.constant 0 : i32
    %c0_i32_1 = arith.constant 0 : i32
    return %c0_i32, %c0_i32_0 : i32, i32
  }
  func.func @transform_2(%arg0: i32, %arg1: i32) -> (i32, i32) {
    %c0_i32 = arith.constant 0 : i32
    %c0_i32_0 = arith.constant 0 : i32
    %c0_i32_1 = arith.constant 0 : i32
    return %c0_i32, %c0_i32_0 : i32, i32
  }
  func.func @transform_3(%arg0: i32, %arg1: i32) -> (i32, i32) {
    %c0_i32 = arith.constant 0 : i32
    %c0_i32_0 = arith.constant 0 : i32
    %c0_i32_1 = arith.constant 0 : i32
    return %c0_i32, %c0_i32_0 : i32, i32
  }
  func.func @transform_4(%arg0: i32, %arg1: i32) -> (i32, i32, i32) {
    %c0_i32 = arith.constant 0 : i32
    %c0_i32_0 = arith.constant 0 : i32
    return %arg1, %c0_i32, %arg0 : i32, i32, i32
  }
}

</mosaic_0001>

<bundles_post_ra>
// kernel: _pixelwise_patch_classifier_forward.1
= control target key start
LH: loop header
LB: loop body
LE: loop exit
PB: predicated region body
PF: predicated region fallthrough
CT: control target
= control target key end

     0   :  { %s673_s15 = smov 0   ;;  %s675_s16 = smov 0   ;;  %s728_s0 = inlined_call_operand.vmem [shape: f32[2,6,12,256], index: 0, kind: input, shape index: {}]   ;;  %s729_s1 = inlined_call_operand.vmem [shape: f32[32,12], index: 1, kind: input, shape index: {}]   ;;  %s730_s2 = inlined_call_operand.vmem [shape: f32[8,32], index: 2, kind: input, shape index: {}]   ;;  %s731_s3 = inlined_call_operand.vmem [shape: f32[5,1], index: 3, kind: input, shape index: {}]   ;;  %s732_s4 = inlined_call_operand.vmem [shape: f32[2,5,256], index: 4, kind: output, shape index: {}]  }
   0x1   :  { %s677_s17 = smov 0  }
   0x2 LB: > { %s23_s18 = sadd.s32 1, %s639_s16  ;;  %p545_p0 = scmp.ge.s32.totalorder %s643_s17, 1  ;;  %s643_s17 = sphi %s677_s17, %s14_s17   ;;  %s639_s16 = sphi %s675_s16, %s734_s16   ;;  %s635_s15 = sphi %s673_s15, %s733_s15  }
   0x3   : > { %p24_p1 = scmp.ge.s32.totalorder %s23_s18, 2  ;;  %p184_p2 = scmp.lt.s32.totalorder %s643_s17, 3 }
   0x5   : > { %s736_s18 = smov (%p24_p1, %s23_s18), 0  ;;  %p185_p3 = pnand %p545_p0, %p184_p2 }
   0x6   : > { %p220_p4 = scmp.lt.s32.totalorder (!%p185_p3), %s635_s15, 1  ;;  %v645_v0 = vmov (!%p185_p3), 0.0   ;;  %vm261_vm0 = vcmask (!%p185_p3), 1043456   ;;  %vm646_vm1 = vmmov (!%p185_p3), 1   ;;  %v244_v7 = vld [vmem:[%s729_s1] sm:$0xff] (!%p185_p3)  ;;  %vm248_vm3 = vcmask (!%p185_p3), 97280  }
   0x7   : > { %188 = sbr.rel (%p185_p3) target bundleno = 483 (0x1e3), region = 36  ;;  %332 = vmatprep.mubr.f32.mxu0 (!%p185_p3), %v645_v0  ;;  %434 = vmatprep.mubr.f32.mxu1 (!%p185_p3), %v645_v0  ;;  %vm564_vm2 = vmpackc.low (!%p185_p3), %vm261_vm0, %vm646_vm1  ;;  %v245_v8 = vld [vmem:[%s729_s1 + $0x8] sm:$0xff] (!%p185_p3)  ;;  %v246_v9 = vld [vmem:[%s729_s1 + $0x10] sm:$0xff] (!%p185_p3)  ;;  %v647_v12 = vmov (!%p185_p3), 0   ;;  %vm366_vm4 = vcmask (!%p185_p3), 261120  }
   0x8   : > { %v247_v10 = vld [vmem:[%s729_s1 + $0x18] sm:$0xff] (!%p185_p3)  ;;  %v441_v11 = vld [vmem:[%s731_s3] sm:$0x1f] (!%p185_p3)  ;;  %604 = vset.pattern.permute.xlu0 (!%p185_p3), %v647_v12 }
   0x9   : > { %444 = vperm.xlu0 (!%p185_p3), %604, %v441_v11   ;;  %v365_v33 = vld [vmem:[%s730_s2] sm:$0xff] (!%p185_p3) }
   0xe   : > { %s738_s15 = smov (!%p220_p4, %s635_s15), 1 }
   0xf   : > { %s546_s19 = smul.u32 192, %s738_s15  ;;  %s562_s9 = sshll.u32 %s738_s15, 4 }
  0x10   : > { %s238_s12 = scalar_lea.vmem %s732_s4, %s562_s9 }
  0x11   : > { %s498_s22 = scalar_lea.vmem %s728_s0, %s546_s19 }
  0x12   : > { %v550_v1 = vld [vmem:[%s498_s22 + $0xa8] sm:$0xff]  ;;  %v552_v2 = vld [vmem:[%s498_s22 + $0xb8] sm:$0xf]  ;;  %v549_v3 = vld [vmem:[%s498_s22 + $0xa0] sm:$0xff] }
  0x13   : > { %v563_v4 = vpack.c.bf16 %v552_v2, %v550_v1  ;;  %v551_v5 = vld [vmem:[%s498_s22 + $0xb0] sm:$0xf] }
  0x14   : > { %v566_v6 = vpack.c.bf16 %v551_v5, %v549_v3 }
  0x15   : > { %565 = vmatprep.subr.msk.bf16.mxu0 %vm564_vm2, %v563_v4 }
  0x16   : > { %568 = vmatpush1.bf16.msk.msra.mxu0 %vm564_vm2, %v566_v6 }
  0x19   : > { %555 = vmatmul.mubr.msk.f32.vlgmr.msra.gmra.mrb[0].mxu0 %vm248_vm3, %v244_v7 }
  0x1a   : > { %338 = vmatprep.mubr.f32.mxu0 %v645_v0 }
  0x1d   : > { %556 = vmatmul.mubr.msk.f32.gmra.mrb[2].mxu0 %vm248_vm3, %v245_v8 }
  0x1e   : > { %344 = vmatprep.mubr.f32.mxu0 %v645_v0 }
  0x21   : > { %557 = vmatmul.mubr.msk.f32.gmra.mrb[4].mxu0 %vm248_vm3, %v246_v9 }
  0x22   : > { %350 = vmatprep.mubr.f32.mxu0 %v645_v0 }
  0x25   : > { %558 = vmatmul.mubr.msk.f32.gmra.mrb[6].mxu0 %vm248_vm3, %v247_v10 }
  0x88   : > { %v445_v34 = vpop.permute.xlu0 %444 }
  0xec   : > { %v334_v13 = vpop.f32.mrb[0].mxu0 }
  0xed   : > { %v336_v14 = vpop.f32.mrb[1].mxu0  ;;  %605 = vtanh.f32 %v334_v13 }
  0xee   : > { %607 = vtanh.f32 %v336_v14 }
  0xf0   : > { %v340_v15 = vpop.f32.mrb[2].mxu0 }
  0xf1   : > { %609 = vtanh.f32 %v340_v15  ;;  %v342_v16 = vpop.f32.mrb[3].mxu0 }
  0xf2   : > { %611 = vtanh.f32 %v342_v16 }
  0xf4   : > { %v346_v17 = vpop.f32.mrb[4].mxu0 }
  0xf5   : > { %v348_v18 = vpop.f32.mrb[5].mxu0  ;;  %613 = vtanh.f32 %v346_v17 }
  0xf6   : > { %615 = vtanh.f32 %v348_v18 }
  0xf7   : > { %v606_v20 = vpop.eup %605 }
  0xf8   : > { %v352_v19 = vpop.f32.mrb[6].mxu0  ;;  %v608_v22 = vpop.eup %607 }
  0xf9   : > { %617 = vtanh.f32 %v352_v19  ;;  %v354_v21 = vpop.f32.mrb[7].mxu0 }
  0xfa   : > { %619 = vtanh.f32 %v354_v21 }
  0xfb   : > { %v610_v23 = vpop.eup %609 }
  0xfc   : > { %v612_v24 = vpop.eup %611  ;;  %v571_v25 = vpack.c.bf16 %v610_v23, %v606_v20 }
  0xfd   : > { %v569_v26 = vpack.c.bf16 %v612_v24, %v608_v22 }
  0xff   : > { %570 = vmatprep.subr.bf16.mxu1 %v569_v26  ;;  %v614_v27 = vpop.eup %613 }
 0x100   : > { %572 = vmatpush1.bf16.msra.mxu1 %v571_v25  ;;  %v616_v28 = vpop.eup %615 }
 0x103   : > { %v618_v29 = vpop.eup %617 }
 0x104   : > { %v620_v30 = vpop.eup %619  ;;  %v575_v31 = vpack.c.bf16 %v618_v29, %v614_v27 }
 0x105   : > { %v573_v32 = vpack.c.bf16 %v620_v30, %v616_v28 }
 0x107   : > { %574 = vmatprep.subr.bf16.mxu1 %v573_v32 }
 0x108   : > { %576 = vmatpush1.bf16.msra.mxu1 %v575_v31 }
 0x10b   : > { %559 = vmatmul.mubr.msk.f32.vlgmr.msra.gmra.mrb[0].mxu1 %vm366_vm4, %v365_v33 }
 0x1de   : > { %v436_v35 = vpop.f32.mrb[0].mxu1 }
 0x1df   : > { %v447_v36 = vadd.f32 %v445_v34, %v436_v35  ;;  %v438_v37 = vpop.f32.mrb[1].mxu1 }
 0x1e0   : > { %v448_v38 = vadd.f32 %v445_v34, %v438_v37 }
 0x1e1   : > { %449 = vst [vmem:[%s238_s12] sm:$0x1f] %v447_v36 }
 0x1e2   : > { %450 = vst [vmem:[%s238_s12 + $0x8] sm:$0x1f] %v448_v38 }
 0x1e3 PF: > { %s14_s17 = sadd.s32 1, %s643_s17   ;;  %s733_s15 = smov %s639_s16 }
 0x1e4   : > { %p11_p5 = scmp.ge.s32.totalorder %s14_s17, 4   ;;  %s734_s16 = smov %s736_s18 }
 0x1e6   :  { %13 = sbr.rel (!%p11_p5) target bundleno = 2 (0x2), region = 66 }

</bundles_post_ra>
